<compile_context>
chip_gen: v6e
topology: v6e:2x2x1
jax: 0.10.0
libtpu: 0.0.40
codegen_flags: <defaults>
</compile_context>

<pallas_src>
import jax
import jax.numpy as jnp
from jax.experimental import pallas as pl
from jax.experimental.pallas import tpu as pltpu

HIDDEN = 500          # logical hidden width (nn.Linear(in_layer, 500))
HIDDEN_PAD = 512      # padded to a multiple of 128
LANE = 128
ROW_ALIGN = 16        # bf16 packs 2 rows per sublane -> (16, 128) native tile
MAX_BLOCK_B = 512     # amortizes step overhead / MXU weight pushes, VMEM-safe
NEG_BIG = -1e30       # masks padded class lanes before softmax (exp -> 0)


def _round_up(x, m):
    return (x + m - 1) // m * m


def _mlp_softmax_kernel(x_ref, w1_ref, b1_ref, w2_ref, b2_ref, o_ref):
    # fc1: bf16 MXU matmul, f32 accumulate; bias-add + ReLU in f32.
    h = jnp.dot(x_ref[...], w1_ref[...], preferred_element_type=jnp.float32)
    h = jnp.maximum(h + b1_ref[...], 0.0)

    # fc2: cast activations back to bf16 for the MXU, accumulate in f32.
    logits = jnp.dot(h.astype(w2_ref.dtype), w2_ref[...],
                     preferred_element_type=jnp.float32) + b2_ref[...]
    # Padded class lanes carry a NEG_BIG bias (set in prepare_params), so they
    # contribute nothing to the softmax denominator.

    # Numerically stable softmax over the class axis (PyTorch dim=1).
    m = jnp.max(logits, axis=-1, keepdims=True)
    e = jnp.exp(logits - m)
    denom = jnp.sum(e, axis=-1, keepdims=True)
    # Exact divide: denom is (block_b, 1), cost is negligible, and rows sum to 1
    # to f32 rounding (the approx reciprocal did not).
    o_ref[...] = (e / denom).astype(o_ref.dtype)


def prepare_params(w1, b1, w2, b2):
    """Pad / transpose / cast nn.Linear parameters ONCE (hoisted out of the
    per-call path).  w1: (500, in), b1: (500,), w2: (out, 500), b2: (out,)."""
    hidden, in_dim = w1.shape
    out_dim, hidden2 = w2.shape
    assert hidden == HIDDEN and hidden2 == HIDDEN

    in_pad = _round_up(in_dim, LANE)
    out_pad = _round_up(out_dim, LANE)
    f32, bf16 = jnp.float32, jnp.bfloat16

    # W1^T: (in_pad, HIDDEN_PAD) bf16, zero-padded (padded hidden units stay 0).
    w1_t = jnp.zeros((in_pad, HIDDEN_PAD), f32).at[:in_dim, :HIDDEN].set(
        jnp.asarray(w1, f32).T).astype(bf16)
    # b1: (1, HIDDEN_PAD) f32, zero-padded (ReLU(0) = 0 on padded units).
    b1_p = jnp.zeros((1, HIDDEN_PAD), f32).at[0, :HIDDEN].set(jnp.asarray(b1, f32))
    # W2^T: (HIDDEN_PAD, out_pad) bf16, zero-padded.
    w2_t = jnp.zeros((HIDDEN_PAD, out_pad), f32).at[:HIDDEN, :out_dim].set(
        jnp.asarray(w2, f32).T).astype(bf16)
    # b2: (1, out_pad) f32; padded class lanes get NEG_BIG -> exp() == 0.
    b2_p = jnp.full((1, out_pad), NEG_BIG, f32).at[0, :out_dim].set(
        jnp.asarray(b2, f32))

    return {"w1_t": w1_t, "b1": b1_p, "w2_t": w2_t, "b2": b2_p,
            "in_dim": in_dim, "out_dim": out_dim,
            "in_pad": in_pad, "out_pad": out_pad}


def neural_net_forward(x, params, *, block_b=None):
    """x: (B, in).  params: output of prepare_params.
    Returns (B, out) softmax probabilities (f32)."""
    B, in_dim = x.shape
    assert in_dim == params["in_dim"]
    in_pad, out_pad = params["in_pad"], params["out_pad"]
    out_dim = params["out_dim"]

    # --- batch tile geometry -------------------------------------------------
    if block_b is None:
        # Aim for >= 2 batch tiles when the batch allows it (so the "parallel"
        # grid axis shards across v7x's two TensorCores), capped at 512 rows to
        # amortize per-step overhead / MXU weight pushes within VMEM limits.
        target = max((B + 1) // 2, ROW_ALIGN)
        block_b = min(_round_up(target, ROW_ALIGN), MAX_BLOCK_B)
    block_b = _round_up(block_b, ROW_ALIGN)
    B_pad = _round_up(B, block_b)

    f32, bf16 = jnp.float32, jnp.bfloat16

    # Only x is padded / cast per call (weights are prepared once).
    x_p = jnp.zeros((B_pad, in_pad), f32).at[:B, :in_dim].set(
        jnp.asarray(x, f32)).astype(bf16)

    # Constant (0,0) index maps -> held resident; single-buffer them.
    resident = pl.Buffered(1)

    out_padded = pl.pallas_call(
        _mlp_softmax_kernel,
        out_shape=jax.ShapeDtypeStruct((B_pad, out_pad), f32),
        grid_spec=pltpu.PrefetchScalarGridSpec(
            num_scalar_prefetch=0,
            grid=(B_pad // block_b,),
            in_specs=[
                pl.BlockSpec((block_b, in_pad), lambda i: (i, 0)),   # x tile
                pl.BlockSpec((in_pad, HIDDEN_PAD), lambda i: (0, 0),
                             pipeline_mode=resident),                # W1^T
                pl.BlockSpec((1, HIDDEN_PAD), lambda i: (0, 0),
                             pipeline_mode=resident),                # b1
                pl.BlockSpec((HIDDEN_PAD, out_pad), lambda i: (0, 0),
                             pipeline_mode=resident),                # W2^T
                pl.BlockSpec((1, out_pad), lambda i: (0, 0),
                             pipeline_mode=resident),                # b2
            ],
            out_specs=pl.BlockSpec((block_b, out_pad), lambda i: (i, 0)),
        ),
        compiler_params=pltpu.CompilerParams(
            dimension_semantics=("parallel",),     # shard batch tiles across TCs
            vmem_limit_bytes=48 * 1024 * 1024,     # fine on v5e/v6e; < v7x 64 MiB
        ),
    )(x_p, params["w1_t"], params["b1"], params["w2_t"], params["b2"])

    # Strip batch / class padding.
    return out_padded[:B, :out_dim]


def _init_params(key, in_layer, out_layer):
    """Deterministic init mimicking nn.Linear default (uniform +/-1/sqrt(fan_in))."""
    k1, k2, k3, k4 = jax.random.split(key, 4)
    bound1 = 1.0 / jnp.sqrt(jnp.float32(in_layer))
    bound2 = 1.0 / jnp.sqrt(jnp.float32(HIDDEN))
    w1 = jax.random.uniform(k1, (HIDDEN, in_layer), jnp.float32, -bound1, bound1)
    b1 = jax.random.uniform(k2, (HIDDEN,), jnp.float32, -bound1, bound1)
    w2 = jax.random.uniform(k3, (out_layer, HIDDEN), jnp.float32, -bound2, bound2)
    b2 = jax.random.uniform(k4, (out_layer,), jnp.float32, -bound2, bound2)
    return w1, b1, w2, b2


if __name__ == "__main__":
    key = jax.random.PRNGKey(0)
    kx, kp = jax.random.split(key)

    B, in_layer, out_layer = 8, 32, 16
    x = jax.random.normal(kx, (B, in_layer), jnp.float32)
    w1, b1, w2, b2 = _init_params(kp, in_layer, out_layer)

    params = prepare_params(w1, b1, w2, b2)   # one-time weight prep (hoisted)
    y = neural_net_forward(x, params)
    y = jax.block_until_ready(y)

    # Reference reproducing the kernel's bf16 matmul-input rounding (f32 accum,
    # f32 bias/ReLU/softmax), so the comparison stays tight.
    xb = x.astype(jnp.bfloat16).astype(jnp.float32)
    w1b = w1.astype(jnp.bfloat16).astype(jnp.float32)
    w2b = w2.astype(jnp.bfloat16).astype(jnp.float32)
    h_ref = jnp.maximum(xb @ w1b.T + b1, 0.0)
    hb = h_ref.astype(jnp.bfloat16).astype(jnp.float32)
    logits_ref = hb @ w2b.T + b2
    y_ref = jax.nn.softmax(logits_ref, axis=1)

    assert y.shape == (B, out_layer)
    assert jnp.allclose(y, y_ref, atol=1e-3, rtol=1e-3)
    assert jnp.allclose(jnp.sum(y, axis=1), 1.0, atol=1e-3)

    print("KERNEL_OK")
</pallas_src>

<mosaic_0001>
module attributes {stable_mosaic.version = 11 : i64} {
  func.func @_mlp_softmax_kernel(%arg0: i32, %arg1: memref<16x128xbf16, #tpu.memory_space<vmem>>, %arg2: memref<128x512xbf16, #tpu.memory_space<vmem>>, %arg3: memref<1x512xf32, #tpu.memory_space<vmem>>, %arg4: memref<512x128xbf16, #tpu.memory_space<vmem>>, %arg5: memref<1x128xf32, #tpu.memory_space<vmem>>, %arg6: memref<16x128xf32, #tpu.memory_space<vmem>>) attributes {dimension_semantics = [#tpu.dimension_semantics<parallel>], iteration_bounds = array<i64: 1>, scalar_prefetch = 0 : i64, scratch_operands = 0 : i64, tpu.core_type = #tpu.core_type<tc>, window_params = [{transform_indices = @transform_0, window_bounds = array<i64: 16, 128>}, {pipeline_mode = #tpu.pipeline_mode<synchronous>, transform_indices = @transform_1, window_bounds = array<i64: 128, 512>}, {pipeline_mode = #tpu.pipeline_mode<synchronous>, transform_indices = @transform_2, window_bounds = array<i64: 1, 512>}, {pipeline_mode = #tpu.pipeline_mode<synchronous>, transform_indices = @transform_3, window_bounds = array<i64: 512, 128>}, {pipeline_mode = #tpu.pipeline_mode<synchronous>, transform_indices = @transform_4, window_bounds = array<i64: 1, 128>}, {transform_indices = @transform_5, window_bounds = array<i64: 16, 128>}]} {
    %c0 = arith.constant 0 : index
    %c0_0 = arith.constant 0 : index
    %0 = vector.load %arg1[%c0, %c0_0] : memref<16x128xbf16, #tpu.memory_space<vmem>>, vector<16x128xbf16>
    %c0_1 = arith.constant 0 : index
    %c0_2 = arith.constant 0 : index
    %1 = vector.load %arg2[%c0_1, %c0_2] : memref<128x512xbf16, #tpu.memory_space<vmem>>, vector<128x512xbf16>
    %cst = arith.constant dense<0.000000e+00> : vector<16x512xf32>
    %2 = tpu.matmul %0, %1, %cst {dimension_numbers = #tpu.dot_dimension_numbers<[1], [0], [0], [1], [0, 0, 1, 1], [], []>} : vector<16x128xbf16>, vector<128x512xbf16>, vector<16x512xf32> -> vector<16x512xf32>
    %c0_3 = arith.constant 0 : index
    %c0_4 = arith.constant 0 : index
    %3 = vector.load %arg3[%c0_3, %c0_4] : memref<1x512xf32, #tpu.memory_space<vmem>>, vector<1x512xf32>
    %4 = vector.broadcast %3 : vector<1x512xf32> to vector<16x512xf32>
    %5 = arith.addf %2, %4 : vector<16x512xf32>
    %cst_5 = arith.constant 0.000000e+00 : f32
    %6 = vector.broadcast %cst_5 : f32 to vector<16x512xf32>
    %7 = arith.maximumf %5, %6 : vector<16x512xf32>
    %8 = arith.truncf %7 : vector<16x512xf32> to vector<16x512xbf16>
    %c0_6 = arith.constant 0 : index
    %c0_7 = arith.constant 0 : index
    %9 = vector.load %arg4[%c0_6, %c0_7] : memref<512x128xbf16, #tpu.memory_space<vmem>>, vector<512x128xbf16>
    %cst_8 = arith.constant dense<0.000000e+00> : vector<16x128xf32>
    %10 = tpu.matmul %8, %9, %cst_8 {dimension_numbers = #tpu.dot_dimension_numbers<[1], [0], [0], [1], [0, 0, 1, 1], [], []>} : vector<16x512xbf16>, vector<512x128xbf16>, vector<16x128xf32> -> vector<16x128xf32>
    %c0_9 = arith.constant 0 : index
    %c0_10 = arith.constant 0 : index
    %11 = vector.load %arg5[%c0_9, %c0_10] : memref<1x128xf32, #tpu.memory_space<vmem>>, vector<1x128xf32>
    %12 = vector.broadcast %11 : vector<1x128xf32> to vector<16x128xf32>
    %13 = arith.addf %10, %12 : vector<16x128xf32>
    %cst_11 = arith.constant dense<0xFF800000> : vector<16xf32>
    %14 = vector.multi_reduction <maximumf>, %13, %cst_11 [1] : vector<16x128xf32> to vector<16xf32>
    %15 = vector.shape_cast %14 : vector<16xf32> to vector<16x1xf32>
    %16 = vector.broadcast %15 : vector<16x1xf32> to vector<16x128xf32>
    %17 = arith.subf %13, %16 : vector<16x128xf32>
    %18 = math.exp %17 : vector<16x128xf32>
    %cst_12 = arith.constant dense<0.000000e+00> : vector<16xf32>
    %19 = vector.multi_reduction <add>, %18, %cst_12 [1] : vector<16x128xf32> to vector<16xf32>
    %20 = vector.shape_cast %19 : vector<16xf32> to vector<16x1xf32>
    %21 = vector.broadcast %20 : vector<16x1xf32> to vector<16x128xf32>
    %22 = arith.divf %18, %21 : vector<16x128xf32>
    %c0_13 = arith.constant 0 : index
    %c0_14 = arith.constant 0 : index
    %23 = vector.load %arg6[%c0_13, %c0_14] : memref<16x128xf32, #tpu.memory_space<vmem>>, vector<16x128xf32>
    tpu.vector_store %arg6[%c0_13, %c0_14], %22 {strides = array<i32>} : memref<16x128xf32, #tpu.memory_space<vmem>>, vector<16x128xf32>,
    return
  }
  func.func @transform_0(%arg0: i32) -> (i32, i32) {
    %c0_i32 = arith.constant 0 : i32
    %c0_i32_0 = arith.constant 0 : i32
    return %arg0, %c0_i32 : i32, i32
  }
  func.func @transform_1(%arg0: i32) -> (i32, i32) {
    %c0_i32 = arith.constant 0 : i32
    %c0_i32_0 = arith.constant 0 : i32
    %c0_i32_1 = arith.constant 0 : i32
    return %c0_i32, %c0_i32_0 : i32, i32
  }
  func.func @transform_2(%arg0: i32) -> (i32, i32) {
    %c0_i32 = arith.constant 0 : i32
    %c0_i32_0 = arith.constant 0 : i32
    %c0_i32_1 = arith.constant 0 : i32
    return %c0_i32, %c0_i32_0 : i32, i32
  }
  func.func @transform_3(%arg0: i32) -> (i32, i32) {
    %c0_i32 = arith.constant 0 : i32
    %c0_i32_0 = arith.constant 0 : i32
    %c0_i32_1 = arith.constant 0 : i32
    return %c0_i32, %c0_i32_0 : i32, i32
  }
  func.func @transform_4(%arg0: i32) -> (i32, i32) {
    %c0_i32 = arith.constant 0 : i32
    %c0_i32_0 = arith.constant 0 : i32
    %c0_i32_1 = arith.constant 0 : i32
    return %c0_i32, %c0_i32_0 : i32, i32
  }
  func.func @transform_5(%arg0: i32) -> (i32, i32) {
    %c0_i32 = arith.constant 0 : i32
    %c0_i32_0 = arith.constant 0 : i32
    return %arg0, %c0_i32 : i32, i32
  }
}

</mosaic_0001>

<bundles_post_ra>
// kernel: tpu_custom_call.1
= control target key start
LH: loop header
LB: loop body
LE: loop exit
PB: predicated region body
PF: predicated region fallthrough
CT: control target
= control target key end

     0   :  { %10 = vsyncpa [#allocation3], 0  ;;  %s1158_s0 = inlined_call_operand.hbm [shape: bf16[16,128], index: 0, kind: input, shape index: {}]   ;;  %s1159_s1 = inlined_call_operand.hbm [shape: bf16[128,512], index: 1, kind: input, shape index: {}]   ;;  %s1160_s2 = inlined_call_operand.hbm [shape: f32[1,512], index: 2, kind: input, shape index: {}]   ;;  %s1161_s3 = inlined_call_operand.hbm [shape: bf16[512,128], index: 3, kind: input, shape index: {}]   ;;  %s1162_s4 = inlined_call_operand.vmem [shape: f32[1,128], index: 4, kind: input, shape index: {}]   ;;  %s1163_s5 = inlined_call_operand.hbm [shape: f32[16,128], index: 5, kind: output, shape index: {}]  }
   0x1   :  { %11 = vsyncpa [#allocation6], 0 }
   0x2   :  { %12 = vsyncpa [#allocation9], 0 }
   0x3   :  { %13 = vsyncpa [#allocation4], 0  ;;  %s1098_s18 = smov [#allocation5]  }
   0x4   :  { %s31_s19 = sshll.u32 %s1098_s18, 4  ;;  %s32_s19 = int_to_ptr.vmem [resolvable:$true] %s31_s19 }
   0x5   :  { %s998_s20 = scalar_lea.vmem %s32_s19, 4096  ;;  %p1003_p1 = scmp.lt.s32.totalorder %s32_s19, %s32_s19 }
   0x6   :  { %p999_p0 = scmp.ne.s32.totalorder %s32_s19, %s998_s20  ;;  %p1004_p2 = scmp.lt.s32.totalorder %s998_s20, %s998_s20 }
   0x8   :  { %p1005_p3 = por %p1004_p2, %p1003_p1 }
   0xa   :  { %p1006_p4 = pnand %p1005_p3, %p999_p0 }
   0xc   :  { %1009 = shalt.err (!%p1006_p4)
}
   0xd   :  { %s1099_s21 = smov 256   ;;  %s1100_s22 = smov 16  }
   0xe   :  { %37 = dma.hbm_to_vmem [thread:$0]  %s1159_s1, 4096, %s32_s19, [#allocation6], %s1099_s21, %s1099_s21, %s1100_s22  }
   0xf   :  { %s1101_s25 = smov [#allocation2]  }
  0x10   :  { %s19_s26 = sshll.u32 %s1101_s25, 4  ;;  %s20_s26 = int_to_ptr.vmem [resolvable:$true] %s19_s26 }
  0x11   :  { %s1018_s27 = scalar_lea.vmem %s20_s26, 128  ;;  %p1023_p6 = scmp.lt.s32.totalorder %s20_s26, %s20_s26 }
  0x12   :  { %p1019_p5 = scmp.ne.s32.totalorder %s20_s26, %s1018_s27  ;;  %p1024_p7 = scmp.lt.s32.totalorder %s1018_s27, %s1018_s27 }
  0x14   :  { %p1025_p8 = por %p1024_p7, %p1023_p6 }
  0x16   :  { %p1026_p9 = pnand %p1025_p8, %p1019_p5 }
  0x18   :  { %1029 = shalt.err (!%p1026_p9)
}
  0x19   :  { %s1102_s28 = smov 64   ;;  %s1103_s29 = smov 4  }
  0x1a   :  { %25 = dma.hbm_to_vmem [thread:$0]  %s1158_s0, 128, %s20_s26, [#allocation3], %s1102_s28, %s1102_s28, %s1103_s29  }
  0x1b   :  { %s1104_s7 = smov [#allocation7]   ;;  %s1105_s9 = smov [#allocation8]  }
  0x1c   :  { %s44_s8 = sshll.u32 %s1104_s7, 4  ;;  %s53_s1 = sshll.u32 %s1105_s9, 4  ;;  %s45_s8 = int_to_ptr.vmem [resolvable:$true] %s44_s8  ;;  %s54_s1 = int_to_ptr.vmem [resolvable:$true] %s53_s1 }
  0x1d   :  { %s1038_s10 = scalar_lea.vmem %s45_s8, 64  ;;  %p1043_p11 = scmp.lt.s32.totalorder %s45_s8, %s45_s8 }
  0x1e   :  { %p1039_p10 = scmp.ne.s32.totalorder %s45_s8, %s1038_s10  ;;  %p1044_p12 = scmp.lt.s32.totalorder %s1038_s10, %s1038_s10 }
  0x20   :  { %p1045_p13 = por %p1044_p12, %p1043_p11 }
  0x22   :  { %p1046_p0 = pnand %p1045_p13, %p1039_p10 }
  0x24   :  { %1049 = shalt.err (!%p1046_p0)
}
  0x25   :  { %47 = dma.hbm_to_vmem [thread:$0]  %s1160_s2, 64, %s45_s8, [#allocation6]  }
  0x26   :  { %s1058_s13 = scalar_lea.vmem %s54_s1, 4096  ;;  %p1063_p2 = scmp.lt.s32.totalorder %s54_s1, %s54_s1 }
  0x27   :  { %p1059_p1 = scmp.ne.s32.totalorder %s54_s1, %s1058_s13  ;;  %p1064_p3 = scmp.lt.s32.totalorder %s1058_s13, %s1058_s13 }
  0x29   :  { %p1065_p4 = por %p1064_p3, %p1063_p2 }
  0x2b   :  { %p1066_p5 = pnand %p1065_p4, %p1059_p1 }
  0x2d   :  { %1069 = shalt.err (!%p1066_p5)
}
  0x2e   :  { %59 = dma.hbm_to_vmem [thread:$0]  %s1161_s3, 4096, %s54_s1, [#allocation9], %s1102_s28, %s1102_s28, %s1103_s29  }
  0x2f   :  { %1090 = dma.done.wait [#allocation3], 128  }
  0x30   :  { %1091 = vsyncadd [#allocation3], 4294967168 }
  0x31   :  { %1092 = dma.done.wait [#allocation6], 4160  }
  0x32   :  { %1093 = vsyncadd [#allocation6], 4294963136 }
  0x33   :  { %1094 = dma.done.wait [#allocation9], 4096  }
  0x34   :  { %1095 = vsyncadd [#allocation9], 4294963200  ;;  %v1106_v0 = vmov 0   ;;  %v901_v1 = vld [vmem:[#allocation5 + $0xe4] ss:$16 sps:$4 sm:$0xff]   ;;  %v950_v33 = vld [vmem:[#allocation8 + $0x78] sm:$0xff]  }
  0x35   :  { %329 = vmatprep.mubr.bf16.mxu0 %v1106_v0  ;;  %372 = vmatprep.mubr.bf16.mxu1 %v1106_v0  ;;  %v903_v2 = vld [vmem:[#allocation5 + $0xec] ss:$16 sps:$4 sm:$0xff]   ;;  %v905_v3 = vld [vmem:[#allocation5 + $0xe0] ss:$16 sps:$4 sm:$0xff]   ;;  %v906_v4 = vld [vmem:[#allocation5 + $0xe8] ss:$16 sps:$4 sm:$0xff]  }
  0x36   :  { %297 = vmatprep.subr.bf16.mxu0 %v901_v1  ;;  %340 = vmatprep.subr.bf16.mxu1 %v903_v2  ;;  %v907_v5 = vld [vmem:[#allocation5 + $0xc4] ss:$16 sps:$4 sm:$0xff]   ;;  %v909_v6 = vld [vmem:[#allocation5 + $0xcc] ss:$16 sps:$4 sm:$0xff]   ;;  %v911_v7 = vld [vmem:[#allocation5 + $0xc0] ss:$16 sps:$4 sm:$0xff]   ;;  %v111_v2 = vlaneseq }
  0x37   :  { %298 = vmatpush1.bf16.msra.mxu0 %v905_v3  ;;  %341 = vmatpush1.bf16.msra.mxu1 %v906_v4  ;;  %v912_v8 = vld [vmem:[#allocation5 + $0xc8] ss:$16 sps:$4 sm:$0xff]   ;;  %v913_v9 = vld [vmem:[#allocation5 + $0xa4] ss:$16 sps:$4 sm:$0xff]   ;;  %v915_v10 = vld [vmem:[#allocation5 + $0xac] ss:$16 sps:$4 sm:$0xff]  }
  0x38   :  { %299 = vmatprep.subr.bf16.mxu0 %v907_v5  ;;  %342 = vmatprep.subr.bf16.mxu1 %v909_v6  ;;  %v917_v11 = vld [vmem:[#allocation5 + $0xa0] ss:$16 sps:$4 sm:$0xff]   ;;  %v918_v12 = vld [vmem:[#allocation5 + $0xa8] ss:$16 sps:$4 sm:$0xff]   ;;  %v919_v13 = vld [vmem:[#allocation5 + $0x84] ss:$16 sps:$4 sm:$0xff]  }
  0x39   :  { %v921_v14 = vld [vmem:[#allocation5 + $0x8c] ss:$16 sps:$4 sm:$0xff]   ;;  %v923_v15 = vld [vmem:[#allocation5 + $0x80] ss:$16 sps:$4 sm:$0xff]   ;;  %v924_v16 = vld [vmem:[#allocation5 + $0x88] ss:$16 sps:$4 sm:$0xff]  }
  0x3a   :  { %v925_v17 = vld [vmem:[#allocation5 + $0x64] ss:$16 sps:$4 sm:$0xff]   ;;  %v927_v18 = vld [vmem:[#allocation5 + $0x6c] ss:$16 sps:$4 sm:$0xff]   ;;  %v929_v19 = vld [vmem:[#allocation5 + $0x60] ss:$16 sps:$4 sm:$0xff]  }
  0x3b   :  { %300 = vmatpush1.bf16.msra.mxu0 %v911_v7  ;;  %343 = vmatpush1.bf16.msra.mxu1 %v912_v8  ;;  %v930_v20 = vld [vmem:[#allocation5 + $0x68] ss:$16 sps:$4 sm:$0xff]   ;;  %v931_v21 = vld [vmem:[#allocation5 + $0x44] ss:$16 sps:$4 sm:$0xff]   ;;  %v933_v22 = vld [vmem:[#allocation5 + $0x4c] ss:$16 sps:$4 sm:$0xff]  }
  0x3c   :  { %301 = vmatprep.subr.bf16.mxu0 %v913_v9  ;;  %344 = vmatprep.subr.bf16.mxu1 %v915_v10  ;;  %v935_v23 = vld [vmem:[#allocation5 + $0x40] ss:$16 sps:$4 sm:$0xff]   ;;  %v936_v24 = vld [vmem:[#allocation5 + $0x48] ss:$16 sps:$4 sm:$0xff]   ;;  %v937_v25 = vld [vmem:[#allocation5 + $0x24] ss:$16 sps:$4 sm:$0xff]  }
  0x3d   :  { %v939_v26 = vld [vmem:[#allocation5 + $0x2c] ss:$16 sps:$4 sm:$0xff]   ;;  %v941_v27 = vld [vmem:[#allocation5 + $0x20] ss:$16 sps:$4 sm:$0xff]   ;;  %v942_v28 = vld [vmem:[#allocation5 + $0x28] ss:$16 sps:$4 sm:$0xff]  }
  0x3e   :  { %v943_v29 = vld [vmem:[#allocation5 + $0x4] ss:$16 sps:$4 sm:$0xff]   ;;  %v945_v30 = vld [vmem:[#allocation5 + $0xc] ss:$16 sps:$4 sm:$0xff]   ;;  %v947_v31 = vld [vmem:[#allocation5] ss:$16 sps:$4 sm:$0xff]  }
  0x3f   :  { %302 = vmatpush1.bf16.msra.mxu0 %v917_v11  ;;  %345 = vmatpush1.bf16.msra.mxu1 %v918_v12  ;;  %v948_v32 = vld [vmem:[#allocation5 + $0x8] ss:$16 sps:$4 sm:$0xff]   ;;  %v951_v35 = vld [vmem:[#allocation8 + $0xf8] sm:$0xff]   ;;  %v958_v42 = vld [vmem:[#allocation8 + $0x68] sm:$0xff]   ;;  %v112_v3 = vshrl.u32 %v111_v2, 7 }
  0x40   :  { %303 = vmatprep.subr.bf16.mxu0 %v919_v13  ;;  %346 = vmatprep.subr.bf16.mxu1 %v921_v14  ;;  %v949_v34 = vld [vmem:[#allocation2] sm:$0xff]   ;;  %v959_v43 = vld [vmem:[#allocation8 + $0xe8] sm:$0xff]   ;;  %v962_v46 = vld [vmem:[#allocation8 + $0x60] sm:$0xff]  }
  0x41   :  { %v952_v36 = vld [vmem:[#allocation8 + $0x38] sm:$0xff]   ;;  %v954_v38 = vld [vmem:[#allocation8 + $0x70] sm:$0xff]   ;;  %v960_v44 = vld [vmem:[#allocation8 + $0x28] sm:$0xff]   ;;  %v117_v4 = vsub.s32 1, %v112_v3  ;;  %v125_v5 = vsub.s32 3, %v112_v3  ;;  %v113_v6 = vsub.s32 0, %v112_v3 }
  0x42   :  { %v953_v37 = vld [vmem:[#allocation8 + $0xb8] sm:$0xff]   ;;  %v955_v39 = vld [vmem:[#allocation8 + $0xf0] sm:$0xff]   ;;  %v961_v45 = vld [vmem:[#allocation8 + $0xa8] sm:$0xff]   ;;  %v121_v7 = vsub.s32 2, %v112_v3 }
  0x43   :  { %304 = vmatpush1.bf16.msra.mxu0 %v923_v15  ;;  %347 = vmatpush1.bf16.msra.mxu1 %v924_v16  ;;  %v956_v40 = vld [vmem:[#allocation8 + $0x30] sm:$0xff]   ;;  %v963_v47 = vld [vmem:[#allocation8 + $0xe0] sm:$0xff]   ;;  %v966_v50 = vld [vmem:[#allocation8 + $0x58] sm:$0xff]  }
  0x44   :  { %305 = vmatprep.subr.bf16.mxu0 %v925_v17  ;;  %348 = vmatprep.subr.bf16.mxu1 %v927_v18  ;;  %v957_v41 = vld [vmem:[#allocation8 + $0xb0] sm:$0xff]   ;;  %v964_v48 = vld [vmem:[#allocation8 + $0x20] sm:$0xff]   ;;  %v967_v51 = vld [vmem:[#allocation8 + $0xd8] sm:$0xff]  }
  0x45   :  { %v965_v49 = vld [vmem:[#allocation8 + $0xa0] sm:$0xff]   ;;  %v968_v52 = vld [vmem:[#allocation8 + $0x18] sm:$0xff]   ;;  %v970_v54 = vld [vmem:[#allocation8 + $0x50] sm:$0xff]  }
  0x46   :  { %v969_v53 = vld [vmem:[#allocation8 + $0x98] sm:$0xff]   ;;  %v971_v55 = vld [vmem:[#allocation8 + $0xd0] sm:$0xff]   ;;  %v974_v58 = vld [vmem:[#allocation8 + $0x48] sm:$0xff]  }
  0x47   :  { %306 = vmatpush1.bf16.msra.mxu0 %v929_v19  ;;  %349 = vmatpush1.bf16.msra.mxu1 %v930_v20  ;;  %v972_v56 = vld [vmem:[#allocation8 + $0x10] sm:$0xff]   ;;  %v975_v59 = vld [vmem:[#allocation8 + $0xc8] sm:$0xff]   ;;  %v978_v62 = vld [vmem:[#allocation8 + $0x40] sm:$0xff]  }
  0x48   :  { %307 = vmatprep.subr.bf16.mxu0 %v931_v21  ;;  %350 = vmatprep.subr.bf16.mxu1 %v933_v22  ;;  %v973_v57 = vld [vmem:[#allocation8 + $0x90] sm:$0xff]   ;;  %v976_v60 = vld [vmem:[#allocation8 + $0x8] sm:$0xff]   ;;  %v979_v63 = vld [vmem:[#allocation8 + $0xc0] sm:$0xff]  }
  0x49   :  { %v977_v61 = vld [vmem:[#allocation8 + $0x88] sm:$0xff]   ;;  %v980_v0 = vld [vmem:[#allocation8] sm:$0xff]   ;;  %v109_v8 = vld [vmem:[#allocation7] sm:$0xf] }
  0x4a   :  { %v981_v1 = vld [vmem:[#allocation8 + $0x80] sm:$0xff]   ;;  %v118_v11 = vrot.slane %v109_v8, %v117_v4  ;;  %v126_v12 = vrot.slane %v109_v8, %v125_v5  ;;  %v114_v13 = vrot.slane %v109_v8, %v113_v6  ;;  %v122_v14 = vrot.slane %v109_v8, %v121_v7 }
  0x4b   :  { %308 = vmatpush1.bf16.msra.mxu0 %v935_v23  ;;  %351 = vmatpush1.bf16.msra.mxu1 %v936_v24 }
  0x4c   :  { %309 = vmatprep.subr.bf16.mxu0 %v937_v25  ;;  %352 = vmatprep.subr.bf16.mxu1 %v939_v26 }
  0x4f   :  { %310 = vmatpush1.bf16.msra.mxu0 %v941_v27  ;;  %353 = vmatpush1.bf16.msra.mxu1 %v942_v28 }
  0x50   :  { %311 = vmatprep.subr.bf16.mxu0 %v943_v29  ;;  %354 = vmatprep.subr.bf16.mxu1 %v945_v30 }
  0x53   :  { %312 = vmatpush1.bf16.msra.mxu0 %v947_v31  ;;  %355 = vmatpush1.bf16.msra.mxu1 %v948_v32 }
  0x54   :  { %845 = vmatprep.subr.bf16.mxu0 %v950_v33  ;;  %867 = vmatprep.subr.bf16.mxu1 %v951_v35 }
  0x56   :  { %330 = vmatmul.mubr.bf16.vlgmr.msra.gmra.mxu0 %v949_v34  ;;  %373 = vmatmul.mubr.bf16.vlgmr.msra.gmra.mxu1 %v949_v34 }
  0x57   :  { %846 = vmatpush3.bf16.msra.mxu0 %v952_v36  ;;  %868 = vmatpush3.bf16.msra.mxu1 %v953_v37 }
  0x58   :  { %847 = vmatprep.subr.bf16.mxu0 %v954_v38  ;;  %869 = vmatprep.subr.bf16.mxu1 %v955_v39 }
  0x5b   :  { %848 = vmatpush3.bf16.msra.mxu0 %v956_v40  ;;  %870 = vmatpush3.bf16.msra.mxu1 %v957_v41 }
  0x5c   :  { %849 = vmatprep.subr.bf16.mxu0 %v958_v42  ;;  %871 = vmatprep.subr.bf16.mxu1 %v959_v43  ;;  %v812_v43 = vld [vmem:[%s1162_s4] ss:$0 sm:$0xff]  ;;  %s1107_s4 = smov [#allocation10]  }
  0x5d   :  { %s765_s15 = sshll.u32 %s1107_s4, 4  ;;  %s766_s15 = int_to_ptr.vmem [resolvable:$true] %s765_s15 }
  0x5e   :  { %s1070_s16 = scalar_lea.vmem %s766_s15, 256  ;;  %p1075_p7 = scmp.lt.s32.totalorder %s766_s15, %s766_s15 }
  0x5f   :  { %850 = vmatpush3.bf16.msra.mxu0 %v960_v44  ;;  %872 = vmatpush3.bf16.msra.mxu1 %v961_v45  ;;  %p1071_p6 = scmp.ne.s32.totalorder %s766_s15, %s1070_s16  ;;  %p1076_p8 = scmp.lt.s32.totalorder %s1070_s16, %s1070_s16 }
  0x60   :  { %851 = vmatprep.subr.bf16.mxu0 %v962_v46  ;;  %873 = vmatprep.subr.bf16.mxu1 %v963_v47 }
  0x61   :  { %p1077_p9 = por %p1076_p8, %p1075_p7 }
  0x63   :  { %852 = vmatpush3.bf16.msra.mxu0 %v964_v48  ;;  %874 = vmatpush3.bf16.msra.mxu1 %v965_v49  ;;  %p1078_p10 = pnand %p1077_p9, %p1071_p6 }
  0x64   :  { %853 = vmatprep.subr.bf16.mxu0 %v966_v50  ;;  %875 = vmatprep.subr.bf16.mxu1 %v967_v51 }
  0x67   :  { %854 = vmatpush3.bf16.msra.mxu0 %v968_v52  ;;  %876 = vmatpush3.bf16.msra.mxu1 %v969_v53 }
  0x68   :  { %855 = vmatprep.subr.bf16.mxu0 %v970_v54  ;;  %877 = vmatprep.subr.bf16.mxu1 %v971_v55 }
  0x6b   :  { %856 = vmatpush3.bf16.msra.mxu0 %v972_v56  ;;  %878 = vmatpush3.bf16.msra.mxu1 %v973_v57 }
  0x6c   :  { %857 = vmatprep.subr.bf16.mxu0 %v974_v58  ;;  %879 = vmatprep.subr.bf16.mxu1 %v975_v59 }
  0x6f   :  { %858 = vmatpush3.bf16.msra.mxu0 %v976_v60  ;;  %880 = vmatpush3.bf16.msra.mxu1 %v977_v61 }
  0x70   :  { %859 = vmatprep.subr.bf16.mxu0 %v978_v62  ;;  %881 = vmatprep.subr.bf16.mxu1 %v979_v63 }
  0x73   :  { %860 = vmatpush3.bf16.msra.mxu0 %v980_v0  ;;  %882 = vmatpush3.bf16.msra.mxu1 %v981_v1 }
 0x116   :  { %v331_v9 = vpop.f32.mrf.mxu0  ;;  %v374_v10 = vpop.f32.mrf.mxu1 }
 0x117   :  { %v332_v23 = vadd.f32 %v331_v9, %v114_v13  ;;  %v375_v24 = vadd.f32 %v374_v10, %v122_v14 }
 0x118   :  { %v333_v15 = vpop.f32.mrf.mxu0  ;;  %v376_v16 = vpop.f32.mrf.mxu1 }
 0x119   :  { %v334_v19 = vadd.f32 %v333_v15, %v118_v11  ;;  %v377_v20 = vadd.f32 %v376_v16, %v126_v12  ;;  %v383_v35 = vmax.f32 %v332_v23, 0.0  ;;  %v385_v36 = vmax.f32 %v375_v24, 0.0 }
 0x11a   :  { %v335_v17 = vpop.f32.mrf.mxu0  ;;  %v378_v18 = vpop.f32.mrf.mxu1 }
 0x11b   :  { %v336_v21 = vadd.f32 %v335_v17, %v114_v13  ;;  %v379_v22 = vadd.f32 %v378_v18, %v122_v14  ;;  %v384_v31 = vmax.f32 %v334_v19, 0.0  ;;  %v386_v32 = vmax.f32 %v377_v20, 0.0 }
 0x11c   :  { %v337_v25 = vpop.f32.mrf.mxu0  ;;  %v380_v26 = vpop.f32.mrf.mxu1 }
 0x11d   :  { %v338_v27 = vadd.f32 %v337_v25, %v118_v11  ;;  %v381_v28 = vadd.f32 %v380_v26, %v126_v12  ;;  %v387_v29 = vmax.f32 %v336_v21, 0.0  ;;  %v389_v30 = vmax.f32 %v379_v22, 0.0 }
 0x11f   :  { %v388_v33 = vmax.f32 %v338_v27, 0.0  ;;  %v390_v34 = vmax.f32 %v381_v28, 0.0  ;;  %v391_v39 = vpack.c.bf16 %v387_v29, %v383_v35  ;;  %v393_v40 = vpack.c.bf16 %v389_v30, %v385_v36 }
 0x121   :  { %v392_v37 = vpack.c.bf16 %v388_v33, %v384_v31  ;;  %v394_v38 = vpack.c.bf16 %v390_v34, %v386_v32 }
 0x123   :  { %690 = vmatprep.mubr.bf16.mxu0 %v392_v37  ;;  %731 = vmatprep.mubr.bf16.mxu1 %v394_v38 }
 0x124   :  { %691 = vmatmul.mubr.bf16.vlgmr.msra.gmra.mxu0 %v391_v39  ;;  %732 = vmatmul.mubr.bf16.vlgmr.msra.gmra.mxu1 %v393_v40 }
 0x1e4   :  { %v861_v41 = vpop.f32.mrf.mxu0  ;;  %v883_v42 = vpop.f32.mrf.mxu1 }
 0x1e6   :  { %v862_v44 = vpop.f32.mrf.mxu0  ;;  %v884_v45 = vpop.f32.mrf.mxu1 }
 0x1e7   :  { %v863_v46 = vadd.f32 %v862_v44, %v861_v41  ;;  %v885_v50 = vadd.f32 %v884_v45, %v883_v42 }
 0x1e8   :  { %v864_v47 = vpop.f32.mrf.mxu0  ;;  %v886_v48 = vpop.f32.mrf.mxu1 }
 0x1e9   :  { %v693_v49 = vadd.f32 %v863_v46, %v812_v43 }
 0x1ea   :  { %v865_v51 = vpop.f32.mrf.mxu0  ;;  %v887_v52 = vpop.f32.mrf.mxu1 }
 0x1eb   :  { %v866_v53 = vadd.f32 %v865_v51, %v864_v47  ;;  %v734_v54 = vadd.f32 %v885_v50, %v693_v49  ;;  %v888_v56 = vadd.f32 %v887_v52, %v886_v48 }
 0x1ed   :  { %v696_v55 = vadd.f32 %v866_v53, %v812_v43  ;;  %740 = vmax.xlane.f32.xlu0 %v734_v54 }
 0x1ef   :  { %v737_v57 = vadd.f32 %v888_v56, %v696_v55 }
 0x1f1   :  { %742 = vmax.xlane.f32.xlu0 %v737_v57 }
 0x276   :  { %v741_v58 = vpop.xlane.xlu0 %740 }
 0x277   :  { %v744_v59 = vsub.f32 %v734_v54, %v741_v58 }
 0x279   :  { %v746_v60 = vmul.f32 1.442695, %v744_v59 }
 0x27a   :  { %v743_v61 = vpop.xlane.xlu0 %742 }
 0x27b   :  { %982 = vpow2.f32 %v746_v60  ;;  %v745_v62 = vsub.f32 %v737_v57, %v743_v61 }
 0x27d   :  { %v748_v63 = vmul.f32 1.442695, %v745_v62 }
 0x27f   :  { %984 = vpow2.f32 %v748_v63 }
 0x288   :  { %v983_v0 = vpop.eup %982 }
 0x289   :  { %750 = vadd.xlane.f32.xlu1 %v983_v0 }
 0x28c   :  { %v985_v1 = vpop.eup %984 }
 0x28d   :  { %752 = vadd.xlane.f32.xlu1 %v985_v1 }
 0x312   :  { %v751_v2 = vpop.xlane.xlu1 %750 }
 0x313   :  { %986 = vrcp.f32 %v751_v2 }
 0x316   :  { %v753_v3 = vpop.xlane.xlu1 %752 }
 0x317   :  { %988 = vrcp.f32 %v753_v3 }
 0x320   :  { %v987_v4 = vpop.eup %986 }
 0x321   :  { %v755_v5 = vmul.f32 %v987_v4, %v983_v0 }
 0x323   :  { %758 = vst [vmem:[#allocation10] sm:$0xff] %v755_v5 }
 0x324   :  { %v989_v6 = vpop.eup %988 }
 0x325   :  { %v757_v7 = vmul.f32 %v989_v6, %v985_v1 }
 0x327   :  { %759 = vst [vmem:[#allocation10 + $0x8] sm:$0xff] %v757_v7 }
 0x328   :  { %1081 = shalt.err (!%p1078_p10)
}
 0x329   :  { %s1108_s17 = smov 128   ;;  %s1109_s18 = smov 8  }
 0x32a   :  { %771 = dma.vmem_to_hbm [thread:$0]  %s766_s15, 256, %s1163_s5, [#allocation4], %s1108_s17, %s1108_s17, %s1109_s18  }
 0x32b   :  { %1096 = dma.done.wait [#allocation4], 256  }
 0x32c   :  { %1097 = vsyncadd [#allocation4], 4294967040 }
 0x32d   :  { %775 = vsyncpa [#allocation3], 1 }
 0x32e   :  { %776 = vsyncpa [#allocation6], 1 }
 0x32f   :  { %777 = vsyncpa [#allocation9], 1 }
 0x330   :  { %778 = vsyncpa [#allocation4], 1 }

</bundles_post_ra>
